<compile_context>
chip_gen: v7x
topology: tpu7x:2x2x1
jax: 0.10.0
libtpu: 0.0.40
codegen_flags: <defaults>
</compile_context>

<pallas_src>
import jax
import jax.numpy as jnp
from jax import lax
from jax.experimental import pallas as pl
from jax.experimental.pallas import tpu as pltpu

EPS = 1e-5
H1 = 200          # fc1 output features
H1P = 256         # h1 block padded to a lane-aligned width (cols 200..255 are 0)
H2 = 300          # fc2 output features
SIDE_W = 384      # packed side-param row width (>= max(H1P, H2), lane multiple)
OUT_LANES = 128   # lane-dense output slab; real scalar output lives in column 0


def _bn_relu_fold(h, gamma, beta, out_dtype=jnp.float32):
    """Training-mode BatchNorm1d (biased var, eps=1e-5) + ReLU.

    One-pass stats (sum, sum of squares) with the affine folded into a single
    scale/shift, then ReLU and (optionally) a dtype downcast in the same
    elementwise pass. Zero input columns stay exactly zero on output.
    """
    inv_n = 1.0 / h.shape[0]
    s1 = jnp.sum(h, axis=0, keepdims=True)
    s2 = jnp.sum(h * h, axis=0, keepdims=True)
    mean = s1 * inv_n
    var = s2 * inv_n - mean * mean            # one-pass variance (fine in f32 here)
    scale = gamma * lax.rsqrt(var + EPS)      # EUP rsqrt
    shift = beta - mean * scale
    return jnp.maximum(h * scale + shift, 0.0).astype(out_dtype)


def critic_kernel(x_ref, wbig_ref, w2at_ref, side_ref, b3_ref, out_ref):
    x = x_ref[...].astype(jnp.bfloat16)

    # ONE fused layer-1 matmul over the block-structured weight:
    #   y[:,   0:256] = state @ W1^T   (cols 200..255 exactly zero)
    #   y[:, 256:556] = action @ W2b^T (action's fc2 contribution)
    y = jnp.dot(x, wbig_ref[...], preferred_element_type=jnp.float32)
    h1_pre = y[:, :H1P]          # starts at lane 0
    a_proj = y[:, H1P:]          # starts at lane 256 (vreg-aligned slice)

    # bn1 + relu + bf16 downcast fused (fc1 bias exactly cancelled by training BN).
    # Padded columns 200..255 stay exactly 0 through BN+ReLU.
    h1 = _bn_relu_fold(h1_pre, side_ref[0:1, :H1P], side_ref[1:2, :H1P],
                       out_dtype=jnp.bfloat16)

    # fc2 on concat([h1, action]) == h1 @ W2a^T + action @ W2b^T (bias cancelled
    # by bn2). W2a^T is zero-padded to 256 input rows, so padded h1 lanes are inert.
    h2_pre = jnp.dot(h1, w2at_ref[...], preferred_element_type=jnp.float32) + a_proj
    h2 = _bn_relu_fold(h2_pre, side_ref[2:3, :H2], side_ref[3:4, :H2])

    # fc3 (N=1): VPU multiply + lane reduce; b3 is an SMEM scalar.
    q = jnp.sum(h2 * side_ref[4:5, :H2], axis=1, keepdims=True) + b3_ref[0]
    out_ref[...] = jnp.broadcast_to(q, out_ref.shape)   # lane-dense unmasked store


def critic_forward(state, action, params):
    B = state.shape[0]
    # NOTE: never zero-pad the batch dim — it would corrupt training-mode BN stats.
    x_cat = jnp.concatenate([state, action], axis=1)     # (B, S+A)

    args = (x_cat, params["w_big"], params["w2at"], params["side"], params["b3"])
    vmem = pl.BlockSpec(memory_space=pltpu.MemorySpace.VMEM)
    smem = pl.BlockSpec(memory_space=pltpu.MemorySpace.SMEM)
    in_specs = [vmem, vmem, vmem, vmem, smem]

    SA = x_cat.shape[1]
    flops = 2 * B * (SA * (H1P + H2) + H1P * H2 + H2)
    bytes_accessed = int(
        sum(int(a.size) * a.dtype.itemsize for a in args) + B * OUT_LANES * 4
    )

    out = pl.pallas_call(
        critic_kernel,
        out_shape=jax.ShapeDtypeStruct((B, OUT_LANES), jnp.float32),
        in_specs=in_specs,
        out_specs=vmem,
        cost_estimate=pl.CostEstimate(
            flops=flops, transcendentals=2 * (H1P + H2),
            bytes_accessed=bytes_accessed),
    )(*args)
    return out[:, :1]   # real (B, 1) critic value


def init_params(key, state_size, action_size):
    """Synthetic init mirroring the PyTorch module shapes / init ranges, packed
    into the kernel's fused layout.

    fc1: (200, S), fc2: (300, 200+A), fc3: (1, 300). fc1/fc2 biases are not
    materialized (exactly cancelled by training-mode BN). Padded weight rows and
    columns are exact zeros — required so padded lanes never leak into real
    features.
    """
    S, A = state_size, action_size
    ks = jax.random.split(key, 4)
    lim1 = 1.0 / jnp.sqrt(H1)   # hidden_init uses weight.size()[0] = out_features
    lim2 = 1.0 / jnp.sqrt(H2)

    w1 = jax.random.uniform(ks[0], (H1, S), jnp.float32, -lim1, lim1)
    w2 = jax.random.uniform(ks[1], (H2, H1 + A), jnp.float32, -lim2, lim2)
    w3 = jax.random.uniform(ks[2], (1, H2), jnp.float32, -3e-3, 3e-3)
    b3 = jax.random.uniform(ks[3], (1,), jnp.float32, -lim2, lim2)

    # Block-structured fused layer-1 weight: (S+A, 256+300), bf16.
    w_big = jnp.zeros((S + A, H1P + H2), jnp.float32)
    w_big = w_big.at[:S, :H1].set(w1.T)            # state  -> h1 cols 0..199
    w_big = w_big.at[S:, H1P:].set(w2[:, H1:].T)   # action -> a_proj cols 256..555

    # fc2 weight acting on h1, zero-padded to 256 input rows: (256, 300), bf16.
    w2at = jnp.zeros((H1P, H2), jnp.float32).at[:H1, :].set(w2[:, :H1].T)

    # Packed f32 side params (5, 384):
    #   row 0: bn1 gamma   row 1: bn1 beta
    #   row 2: bn2 gamma   row 3: bn2 beta
    #   row 4: fc3 weight
    side = jnp.zeros((5, SIDE_W), jnp.float32)
    side = side.at[0, :H1P].set(1.0)    # bn1 gamma (PyTorch default 1); padding inert
    side = side.at[2, :H2].set(1.0)     # bn2 gamma
    side = side.at[4, :H2].set(w3[0])   # fc3 weight row

    return {
        "w_big": w_big.astype(jnp.bfloat16),
        "w2at": w2at.astype(jnp.bfloat16),
        "side": side,
        "b3": b3,          # (1,) -> SMEM scalar
    }


def critic_ref(state, action, p):
    """Pure-JAX reference mirroring the kernel numerics (bf16 matmuls, f32 accum,
    one-pass folded training-mode BN)."""
    x = jnp.concatenate([state, action], axis=1).astype(jnp.bfloat16)
    y = jnp.dot(x, p["w_big"], preferred_element_type=jnp.float32)
    h1 = _bn_relu_fold(y[:, :H1P], p["side"][0:1, :H1P], p["side"][1:2, :H1P],
                       out_dtype=jnp.bfloat16)
    h2 = jnp.dot(h1, p["w2at"], preferred_element_type=jnp.float32) + y[:, H1P:]
    h2 = _bn_relu_fold(h2, p["side"][2:3, :H2], p["side"][3:4, :H2])
    return jnp.sum(h2 * p["side"][4:5, :H2], axis=1, keepdims=True) + p["b3"][0]


if __name__ == "__main__":
    key = jax.random.PRNGKey(0)
    k_state, k_action, k_params = jax.random.split(key, 3)

    batch, state_size, action_size = 8, 24, 4
    state = jax.random.normal(k_state, (batch, state_size), jnp.float32)
    action = jax.random.normal(k_action, (batch, action_size), jnp.float32)
    params = init_params(k_params, state_size, action_size)

    out = critic_forward(state, action, params)
    jax.block_until_ready(out)

    ref = critic_ref(state, action, params)
    assert out.shape == (batch, 1)
    assert jnp.allclose(out, ref, atol=1e-3, rtol=1e-3), (
        f"max abs err {jnp.max(jnp.abs(out - ref))}")
    print("KERNEL_OK")
</pallas_src>

<mosaic_0001>
module attributes {stable_mosaic.version = 11 : i64} {
  func.func @critic_kernel(%arg0: memref<8x28xf32, #tpu.memory_space<vmem>>, %arg1: memref<28x556xbf16, #tpu.memory_space<vmem>>, %arg2: memref<256x300xbf16, #tpu.memory_space<vmem>>, %arg3: memref<5x384xf32, #tpu.memory_space<vmem>>, %arg4: memref<1xf32, #tpu.memory_space<smem>>, %arg5: memref<8x128xf32, #tpu.memory_space<vmem>>) attributes {dimension_semantics = [], scalar_prefetch = 0 : i64, scratch_operands = 0 : i64, tpu.core_type = #tpu.core_type<tc>} {
    %c0 = arith.constant 0 : index
    %c0_0 = arith.constant 0 : index
    %0 = vector.load %arg0[%c0, %c0_0] : memref<8x28xf32, #tpu.memory_space<vmem>>, vector<8x28xf32>
    %1 = arith.truncf %0 : vector<8x28xf32> to vector<8x28xbf16>
    %c0_1 = arith.constant 0 : index
    %c0_2 = arith.constant 0 : index
    %2 = vector.load %arg1[%c0_1, %c0_2] : memref<28x556xbf16, #tpu.memory_space<vmem>>, vector<28x556xbf16>
    %cst = arith.constant dense<0.000000e+00> : vector<8x556xf32>
    %3 = tpu.matmul %1, %2, %cst {dimension_numbers = #tpu.dot_dimension_numbers<[1], [0], [0], [1], [0, 0, 1, 1], [], []>} : vector<8x28xbf16>, vector<28x556xbf16>, vector<8x556xf32> -> vector<8x556xf32>
    %4 = vector.extract_strided_slice %3 {offsets = [0, 0], sizes = [8, 256], strides = [1, 1]} : vector<8x556xf32> to vector<8x256xf32>
    %5 = vector.extract_strided_slice %3 {offsets = [0, 256], sizes = [8, 300], strides = [1, 1]} : vector<8x556xf32> to vector<8x300xf32>
    %c0_3 = arith.constant 0 : index
    %c0_4 = arith.constant 0 : index
    %6 = vector.load %arg3[%c0_3, %c0_4] : memref<5x384xf32, #tpu.memory_space<vmem>>, vector<1x256xf32>
    %c1 = arith.constant 1 : index
    %c0_5 = arith.constant 0 : index
    %7 = vector.load %arg3[%c1, %c0_5] : memref<5x384xf32, #tpu.memory_space<vmem>>, vector<1x256xf32>
    %cst_6 = arith.constant dense<0.000000e+00> : vector<256xf32>
    %8 = vector.multi_reduction <add>, %4, %cst_6 [0] : vector<8x256xf32> to vector<256xf32>
    %9 = vector.shape_cast %8 : vector<256xf32> to vector<1x256xf32>
    %10 = arith.mulf %4, %4 : vector<8x256xf32>
    %cst_7 = arith.constant dense<0.000000e+00> : vector<256xf32>
    %11 = vector.multi_reduction <add>, %10, %cst_7 [0] : vector<8x256xf32> to vector<256xf32>
    %12 = vector.shape_cast %11 : vector<256xf32> to vector<1x256xf32>
    %cst_8 = arith.constant 1.250000e-01 : f32
    %13 = vector.broadcast %cst_8 : f32 to vector<1x256xf32>
    %14 = arith.mulf %9, %13 : vector<1x256xf32>
    %cst_9 = arith.constant 1.250000e-01 : f32
    %15 = vector.broadcast %cst_9 : f32 to vector<1x256xf32>
    %16 = arith.mulf %12, %15 : vector<1x256xf32>
    %17 = arith.mulf %14, %14 : vector<1x256xf32>
    %18 = arith.subf %16, %17 : vector<1x256xf32>
    %cst_10 = arith.constant 9.99999974E-6 : f32
    %19 = vector.broadcast %cst_10 : f32 to vector<1x256xf32>
    %20 = arith.addf %18, %19 : vector<1x256xf32>
    %21 = math.rsqrt %20 : vector<1x256xf32>
    %22 = arith.mulf %6, %21 : vector<1x256xf32>
    %23 = arith.mulf %14, %22 : vector<1x256xf32>
    %24 = arith.subf %7, %23 : vector<1x256xf32>
    %25 = vector.broadcast %22 : vector<1x256xf32> to vector<8x256xf32>
    %26 = arith.mulf %4, %25 : vector<8x256xf32>
    %27 = vector.broadcast %24 : vector<1x256xf32> to vector<8x256xf32>
    %28 = arith.addf %26, %27 : vector<8x256xf32>
    %cst_11 = arith.constant 0.000000e+00 : f32
    %29 = vector.broadcast %cst_11 : f32 to vector<8x256xf32>
    %30 = arith.maximumf %28, %29 : vector<8x256xf32>
    %31 = arith.truncf %30 : vector<8x256xf32> to vector<8x256xbf16>
    %c0_12 = arith.constant 0 : index
    %c0_13 = arith.constant 0 : index
    %32 = vector.load %arg2[%c0_12, %c0_13] : memref<256x300xbf16, #tpu.memory_space<vmem>>, vector<256x300xbf16>
    %cst_14 = arith.constant dense<0.000000e+00> : vector<8x300xf32>
    %33 = tpu.matmul %31, %32, %cst_14 {dimension_numbers = #tpu.dot_dimension_numbers<[1], [0], [0], [1], [0, 0, 1, 1], [], []>} : vector<8x256xbf16>, vector<256x300xbf16>, vector<8x300xf32> -> vector<8x300xf32>
    %34 = arith.addf %33, %5 : vector<8x300xf32>
    %c2 = arith.constant 2 : index
    %c0_15 = arith.constant 0 : index
    %35 = vector.load %arg3[%c2, %c0_15] : memref<5x384xf32, #tpu.memory_space<vmem>>, vector<1x300xf32>
    %c3 = arith.constant 3 : index
    %c0_16 = arith.constant 0 : index
    %36 = vector.load %arg3[%c3, %c0_16] : memref<5x384xf32, #tpu.memory_space<vmem>>, vector<1x300xf32>
    %cst_17 = arith.constant dense<0.000000e+00> : vector<300xf32>
    %37 = vector.multi_reduction <add>, %34, %cst_17 [0] : vector<8x300xf32> to vector<300xf32>
    %38 = vector.shape_cast %37 : vector<300xf32> to vector<1x300xf32>
    %39 = arith.mulf %34, %34 : vector<8x300xf32>
    %cst_18 = arith.constant dense<0.000000e+00> : vector<300xf32>
    %40 = vector.multi_reduction <add>, %39, %cst_18 [0] : vector<8x300xf32> to vector<300xf32>
    %41 = vector.shape_cast %40 : vector<300xf32> to vector<1x300xf32>
    %cst_19 = arith.constant 1.250000e-01 : f32
    %42 = vector.broadcast %cst_19 : f32 to vector<1x300xf32>
    %43 = arith.mulf %38, %42 : vector<1x300xf32>
    %cst_20 = arith.constant 1.250000e-01 : f32
    %44 = vector.broadcast %cst_20 : f32 to vector<1x300xf32>
    %45 = arith.mulf %41, %44 : vector<1x300xf32>
    %46 = arith.mulf %43, %43 : vector<1x300xf32>
    %47 = arith.subf %45, %46 : vector<1x300xf32>
    %cst_21 = arith.constant 9.99999974E-6 : f32
    %48 = vector.broadcast %cst_21 : f32 to vector<1x300xf32>
    %49 = arith.addf %47, %48 : vector<1x300xf32>
    %50 = math.rsqrt %49 : vector<1x300xf32>
    %51 = arith.mulf %35, %50 : vector<1x300xf32>
    %52 = arith.mulf %43, %51 : vector<1x300xf32>
    %53 = arith.subf %36, %52 : vector<1x300xf32>
    %54 = vector.broadcast %51 : vector<1x300xf32> to vector<8x300xf32>
    %55 = arith.mulf %34, %54 : vector<8x300xf32>
    %56 = vector.broadcast %53 : vector<1x300xf32> to vector<8x300xf32>
    %57 = arith.addf %55, %56 : vector<8x300xf32>
    %cst_22 = arith.constant 0.000000e+00 : f32
    %58 = vector.broadcast %cst_22 : f32 to vector<8x300xf32>
    %59 = arith.maximumf %57, %58 : vector<8x300xf32>
    %c4 = arith.constant 4 : index
    %c0_23 = arith.constant 0 : index
    %60 = vector.load %arg3[%c4, %c0_23] : memref<5x384xf32, #tpu.memory_space<vmem>>, vector<1x300xf32>
    %61 = vector.broadcast %60 : vector<1x300xf32> to vector<8x300xf32>
    %62 = arith.mulf %59, %61 : vector<8x300xf32>
    %cst_24 = arith.constant dense<0.000000e+00> : vector<8xf32>
    %63 = vector.multi_reduction <add>, %62, %cst_24 [1] : vector<8x300xf32> to vector<8xf32>
    %64 = vector.shape_cast %63 : vector<8xf32> to vector<8x1xf32>
    %c0_25 = arith.constant 0 : index
    %65 = memref.load %arg4[%c0_25] : memref<1xf32, #tpu.memory_space<smem>>
    %66 = vector.broadcast %65 : f32 to vector<8x1xf32>
    %67 = arith.addf %64, %66 : vector<8x1xf32>
    %68 = vector.shape_cast %67 : vector<8x1xf32> to vector<8x1xf32>
    %69 = vector.broadcast %68 : vector<8x1xf32> to vector<8x128xf32>
    %c0_26 = arith.constant 0 : index
    %c0_27 = arith.constant 0 : index
    %70 = vector.load %arg5[%c0_26, %c0_27] : memref<8x128xf32, #tpu.memory_space<vmem>>, vector<8x128xf32>
    tpu.vector_store %arg5[%c0_26, %c0_27], %69 {strides = array<i32>} : memref<8x128xf32, #tpu.memory_space<vmem>>, vector<8x128xf32>,
    return
  }
}

</mosaic_0001>

<bundles_post_ra>
// kernel: tpu_custom_call.1
= control target key start
LH: loop header
LB: loop body
LE: loop exit
PB: predicated region body
PF: predicated region fallthrough
CT: control target
= control target key end

     0   :  { %vm88_vm0 = vcmask 1045504   ;;  %v1165_v2 = vmov 0   ;;  %vm84_vm1 = vcmask 228352   ;;  %s1470_s0 = inlined_call_operand.vmem [shape: f32[8,28], index: 0, kind: input, shape index: {}]   ;;  %s1471_s1 = inlined_call_operand.vmem [shape: bf16[28,556], index: 1, kind: input, shape index: {}]   ;;  %s1472_s2 = inlined_call_operand.vmem [shape: bf16[256,300], index: 2, kind: input, shape index: {}]   ;;  %s1473_s3 = inlined_call_operand.vmem [shape: f32[5,384], index: 3, kind: input, shape index: {}]   ;;  %s1474_s4 = inlined_call_operand.<no memory space> [shape: f32[1], index: 4, kind: input, shape index: {}]   ;;  %s1475_s5 = inlined_call_operand.hbm [shape: f32[8,128], index: 5, kind: output, shape index: {}]  }
   0x1   :  { %v1053_v0 = vld [vmem:[%s1471_s1 + $0x4] ss:$20 sps:$4 sm:$0xff]   ;;  %v1055_v1 = vld [vmem:[%s1471_s1] ss:$20 sps:$4 sm:$0xff]   ;;  %136 = vmatprep.mubr.bf16.mxu0 %v1165_v2 }
   0x2   :  { %104 = vmatprep.subr.bf16.mxu0 %v1053_v0  ;;  %v1056_v3 = vld [vmem:[%s1471_s1 + $0x2c] ss:$20 sps:$4 sm:$0x3f]   ;;  %v1058_v4 = vld [vmem:[%s1471_s1 + $0x28] ss:$20 sps:$4 sm:$0x3f]  }
   0x3   :  { %105 = vmatpush1.bf16.msra.mxu0 %v1055_v1  ;;  %v23_v5 = vld [vmem:[%s1470_s0] sm:$0xff]  ;;  %v90_v6 = vsel %vm88_vm0, %v1058_v4, 0 }
   0x4   :  { %956 = vmatprep.subr.msk.bf16.mxu0 %vm88_vm0, %v1056_v3  ;;  %v1059_v7 = vld [vmem:[%s1472_s2 + $0x4] ss:$12 sps:$4 sm:$0xff]   ;;  %v1061_v8 = vld [vmem:[%s1472_s2] ss:$12 sps:$4 sm:$0xff]   ;;  %v24_v9 = vpack.c.bf16 %v23_v5, %v23_v5 }
   0x5   :  { %657 = vmatprep.subr.bf16.mxu1 %v1059_v7 }
   0x6   :  { %658 = vmatpush1.bf16.msra.mxu1 %v1061_v8 }
   0x7   :  { %107 = vmatpush1.bf16.msra.mxu0 %v90_v6 }
   0xa   :  { %957 = vmatmul.mubr.msk.bf16.vlgmr.msra.gmra.mrb[0].mxu0 %vm84_vm1, %v24_v9 }
   0xb   :  { %177 = vmatprep.mubr.bf16.mxu0 %v1165_v2 }
   0xc   :  { %11 = vsyncpa [#allocation4], 0  ;;  %v1062_v10 = vld [vmem:[%s1472_s2 + $0x1c] ss:$12 sps:$4 sm:$0xff]   ;;  %v1064_v11 = vld [vmem:[%s1472_s2 + $0x18] ss:$12 sps:$4 sm:$0xff]  }
   0xd   :  { %659 = vmatprep.subr.bf16.mxu1 %v1062_v10  ;;  %v1065_v12 = vld [vmem:[%s1472_s2 + $0x34] ss:$12 sps:$4 sm:$0xff]   ;;  %v1067_v13 = vld [vmem:[%s1472_s2 + $0x30] ss:$12 sps:$4 sm:$0xff]   ;;  %v1068_v14 = vld [vmem:[%s1472_s2 + $0x4c] ss:$12 sps:$4 sm:$0xff]  }
   0xe   :  { %660 = vmatpush1.bf16.msra.mxu1 %v1064_v11  ;;  %v1070_v15 = vld [vmem:[%s1472_s2 + $0x48] ss:$12 sps:$4 sm:$0xff]   ;;  %v1073_v16 = vld [vmem:[%s1471_s1 + $0xc] ss:$20 sps:$4 sm:$0xff]   ;;  %v1074_v18 = vld [vmem:[%s1472_s2 + $0x64] ss:$12 sps:$4 sm:$0xff]  }
   0xf   :  { %661 = vmatprep.subr.bf16.mxu1 %v1065_v12  ;;  %v1071_v17 = vld [vmem:[%s1471_s1 + $0x8] ss:$20 sps:$4 sm:$0xff]   ;;  %145 = vmatprep.subr.bf16.mxu0 %v1073_v16  ;;  %v1076_v19 = vld [vmem:[%s1472_s2 + $0x60] ss:$12 sps:$4 sm:$0xff]   ;;  %v1082_v24 = vld [vmem:[%s1472_s2 + $0x78] ss:$12 sps:$4 sm:$0xff]  }
  0x10   :  { %146 = vmatpush1.bf16.msra.mxu0 %v1071_v17  ;;  %v1077_v20 = vld [vmem:[%s1471_s1 + $0x34] ss:$20 sps:$4 sm:$0x3f]   ;;  %v1079_v21 = vld [vmem:[%s1471_s1 + $0x30] ss:$20 sps:$4 sm:$0x3f]  }
  0x11   :  { %958 = vmatprep.subr.msk.bf16.mxu0 %vm88_vm0, %v1077_v20  ;;  %v96_v22 = vsel %vm88_vm0, %v1079_v21, 0  ;;  %v1080_v23 = vld [vmem:[%s1472_s2 + $0x7c] ss:$12 sps:$4 sm:$0xff]   ;;  %v1083_v25 = vld [vmem:[%s1471_s1 + $0x10] ss:$20 sps:$4 sm:$0xff]   ;;  %v1166_v26 = vmov 0.0  }
  0x12   :  { %662 = vmatpush1.bf16.msra.mxu1 %v1067_v13  ;;  %v1084_v27 = vld [vmem:[%s1472_s2 + $0x94] ss:$12 sps:$4 sm:$0xff]   ;;  %v1086_v28 = vld [vmem:[%s1472_s2 + $0x90] ss:$12 sps:$4 sm:$0xff]   ;;  %v1088_v30 = vld [vmem:[%s1472_s2 + $0xac] ss:$12 sps:$4 sm:$0xff]  }
  0x13   :  { %663 = vmatprep.subr.bf16.mxu1 %v1068_v14  ;;  %v1087_v29 = vld [vmem:[%s1471_s1 + $0x38] ss:$20 sps:$4 sm:$0x3f]   ;;  %vm1167_vm2 = vmmov 0   ;;  %v1090_v31 = vld [vmem:[%s1472_s2 + $0xa8] ss:$12 sps:$4 sm:$0xff]  }
  0x14   :  { %148 = vmatpush1.bf16.msra.mxu0 %v96_v22  ;;  %v1093_v32 = vld [vmem:[%s1472_s2 + $0xc8] ss:$12 sps:$4 sm:$0xff]   ;;  %v102_v33 = vsel %vm88_vm0, %v1087_v29, 0  ;;  %v1091_v34 = vld [vmem:[%s1472_s2 + $0xc4] ss:$12 sps:$4 sm:$0xff]   ;;  %vm754_vm3 = vcmask 359424  }
  0x15   :  { %1038 = vmatprep.subr.bf16.mxu0 %v1166_v26  ;;  %v1095_v35 = vld [vmem:[%s1472_s2 + $0x8] ss:$12 sps:$4 sm:$0xff]   ;;  %v1098_v36 = vld [vmem:[%s1472_s2 + $0xe0] ss:$12 sps:$4 sm:$0xff]   ;;  %v1103_v40 = vld [vmem:[%s1472_s2 + $0xf8] ss:$12 sps:$4 sm:$0xff]  }
  0x16   :  { %664 = vmatpush1.bf16.msra.mxu1 %v1070_v15  ;;  %v1094_v37 = vld [vmem:[%s1472_s2 + $0xc0] ss:$12 sps:$4 sm:$0xff]   ;;  %v1096_v38 = vld [vmem:[%s1472_s2 + $0xdc] ss:$12 sps:$4 sm:$0xff]   ;;  %v1099_v41 = vld [vmem:[%s1472_s2 + $0xd8] ss:$12 sps:$4 sm:$0xff]  }
  0x17   :  { %665 = vmatprep.subr.bf16.mxu1 %v1074_v18  ;;  %959 = vmatmul.mubr.msk.bf16.vlgmr.msra.gmra.mrb[4].mxu0 %vm84_vm1, %v24_v9  ;;  %v1100_v39 = vld [vmem:[%s1472_s2 + $0x20] ss:$12 sps:$4 sm:$0xff]   ;;  %v1105_v43 = vld [vmem:[%s1472_s2 + $0x38] ss:$12 sps:$4 sm:$0xff]   ;;  %v1108_v44 = vld [vmem:[%s1472_s2 + $0x110] ss:$12 sps:$4 sm:$0xff]  }
  0x18   :  { %1039 = vmatpush3.bf16.msra.mxu0 %v1083_v25  ;;  %1042 = vmatprep.mubr.msk.bf16.mxu0 %vm1167_vm2, %v1166_v26  ;;  %v1101_v42 = vld [vmem:[%s1472_s2 + $0xf4] ss:$12 sps:$4 sm:$0xff]   ;;  %v1104_v45 = vld [vmem:[%s1472_s2 + $0xf0] ss:$12 sps:$4 sm:$0xff]   ;;  %v1106_v46 = vld [vmem:[%s1472_s2 + $0x10c] ss:$12 sps:$4 sm:$0xff]  }
  0x19   :  { %1040 = vmatprep.subr.bf16.mxu0 %v1166_v26  ;;  %v1110_v47 = vld [vmem:[%s1472_s2 + $0x50] ss:$12 sps:$4 sm:$0xff]   ;;  %v1113_v48 = vld [vmem:[%s1472_s2 + $0x128] ss:$12 sps:$4 sm:$0xff]   ;;  %v1118_v52 = vld [vmem:[%s1472_s2 + $0x140] ss:$12 sps:$4 sm:$0xff]  }
  0x1a   :  { %666 = vmatpush1.bf16.msra.mxu1 %v1076_v19  ;;  %v1109_v49 = vld [vmem:[%s1472_s2 + $0x108] ss:$12 sps:$4 sm:$0xff]   ;;  %v1111_v50 = vld [vmem:[%s1472_s2 + $0x124] ss:$12 sps:$4 sm:$0xff]   ;;  %v1114_v53 = vld [vmem:[%s1472_s2 + $0x120] ss:$12 sps:$4 sm:$0xff]  }
  0x1b   :  { %667 = vmatprep.subr.bf16.mxu1 %v1080_v23  ;;  %v1115_v51 = vld [vmem:[%s1472_s2 + $0x68] ss:$12 sps:$4 sm:$0xff]   ;;  %v1120_v55 = vld [vmem:[%s1472_s2 + $0x80] ss:$12 sps:$4 sm:$0xff]   ;;  %v1123_v56 = vld [vmem:[%s1472_s2 + $0x158] ss:$12 sps:$4 sm:$0xff]  }
  0x1c   :  { %1041 = vmatpush3.bf16.msra.mxu0 %v102_v33  ;;  %v1116_v54 = vld [vmem:[%s1472_s2 + $0x13c] ss:$12 sps:$4 sm:$0xff]   ;;  %v1119_v57 = vld [vmem:[%s1472_s2 + $0x138] ss:$12 sps:$4 sm:$0xff]   ;;  %v1121_v58 = vld [vmem:[%s1472_s2 + $0x154] ss:$12 sps:$4 sm:$0xff]  }
  0x1d   :  { %1016 = vmatprep.subr.bf16.mxu0 %v1093_v32  ;;  %v1125_v59 = vld [vmem:[%s1472_s2 + $0x98] ss:$12 sps:$4 sm:$0xff]   ;;  %v1128_v60 = vld [vmem:[%s1472_s2 + $0x170] ss:$12 sps:$4 sm:$0xff]   ;;  %v1129_v0 = vld [vmem:[%s1472_s2 + $0x168] ss:$12 sps:$4 sm:$0xff]  }
  0x1e   :  { %668 = vmatpush1.bf16.msra.mxu1 %v1082_v24  ;;  %v1124_v61 = vld [vmem:[%s1472_s2 + $0x150] ss:$12 sps:$4 sm:$0xff]   ;;  %v1126_v62 = vld [vmem:[%s1472_s2 + $0x16c] ss:$12 sps:$4 sm:$0xff]   ;;  %s1169_s13 = smov [#allocation3]  }
  0x1f   :  { %669 = vmatprep.subr.bf16.mxu1 %v1084_v27  ;;  %1043 = vmatmul.mubr.msk.bf16.vlgmr.msra.gmra.mrb[8].mxu0 %vm84_vm1, %v24_v9  ;;  %v1130_v63 = vld [vmem:[%s1472_s2 + $0xb0] ss:$12 sps:$4 sm:$0xff]   ;;  %s938_s14 = sshll.u32 %s1169_s13, 4  ;;  %s939_s14 = int_to_ptr.vmem [resolvable:$true] %s938_s14 }
  0x20   :  { %1017 = vmatpush3.bf16.msra.mxu0 %v1095_v35  ;;  %s1141_s15 = scalar_lea.vmem %s939_s14, 128  ;;  %p1146_p1 = scmp.lt.s32.totalorder %s939_s14, %s939_s14 }
  0x21   :  { %1018 = vmatprep.subr.bf16.mxu0 %v1098_v36  ;;  %p1142_p0 = scmp.ne.s32.totalorder %s939_s14, %s1141_s15  ;;  %p1147_p2 = scmp.lt.s32.totalorder %s1141_s15, %s1141_s15 }
  0x22   :  { %670 = vmatpush1.bf16.msra.mxu1 %v1086_v28 }
  0x23   :  { %671 = vmatprep.subr.bf16.mxu1 %v1088_v30  ;;  %p1148_p3 = por %p1147_p2, %p1146_p1 }
  0x24   :  { %1019 = vmatpush3.bf16.msra.mxu0 %v1100_v39 }
  0x25   :  { %1020 = vmatprep.subr.bf16.mxu0 %v1103_v40  ;;  %p1149_p4 = pnand %p1148_p3, %p1142_p0 }
  0x26   :  { %672 = vmatpush1.bf16.msra.mxu1 %v1090_v31 }
  0x27   :  { %673 = vmatprep.subr.bf16.mxu1 %v1091_v34 }
  0x28   :  { %1021 = vmatpush3.bf16.msra.mxu0 %v1105_v43  ;;  %v273_v43 = vlaneseq }
  0x29   :  { %1022 = vmatprep.subr.bf16.mxu0 %v1108_v44 }
  0x2a   :  { %674 = vmatpush1.bf16.msra.mxu1 %v1094_v37 }
  0x2b   :  { %675 = vmatprep.subr.bf16.mxu1 %v1096_v38 }
  0x2c   :  { %1023 = vmatpush3.bf16.msra.mxu0 %v1110_v47 }
  0x2d   :  { %1024 = vmatprep.subr.bf16.mxu0 %v1113_v48 }
  0x2e   :  { %676 = vmatpush1.bf16.msra.mxu1 %v1099_v41  ;;  %v1168_v41 = vmov 1966171168  }
  0x2f   :  { %677 = vmatprep.subr.bf16.mxu1 %v1101_v42  ;;  %v271_v42 = vunpack.c.l.s4 %v1168_v41 }
  0x30   :  { %1025 = vmatpush3.bf16.msra.mxu0 %v1115_v51  ;;  %v226_v51 = vld [vmem:[%s1473_s3] ss:$8 sm:$0x3] }
  0x31   :  { %1026 = vmatprep.subr.bf16.mxu0 %v1118_v52  ;;  %v272_v44 = vunpack.c.0.s8 %v271_v42 }
  0x32   :  { %678 = vmatpush1.bf16.msra.mxu1 %v1104_v45  ;;  %v1385_v45 = vshrl.u32 %v273_v43, 7 }
  0x33   :  { %679 = vmatprep.subr.bf16.mxu1 %v1106_v46 }
  0x34   :  { %1027 = vmatpush3.bf16.msra.mxu0 %v1120_v55  ;;  %v1388_v47 = vsub.s32 %v272_v44, %v1385_v45 }
  0x35   :  { %1028 = vmatprep.subr.bf16.mxu0 %v1123_v56 }
  0x36   :  { %680 = vmatpush1.bf16.msra.mxu1 %v1109_v49 }
  0x37   :  { %681 = vmatprep.subr.bf16.mxu1 %v1111_v50 }
  0x38   :  { %1029 = vmatpush3.bf16.msra.mxu0 %v1125_v59 }
  0x39   :  { %1030 = vmatprep.subr.bf16.mxu0 %v1128_v60 }
  0x3a   :  { %682 = vmatpush1.bf16.msra.mxu1 %v1114_v53  ;;  %v1396_v53 = vsub.s32 0, %v1385_v45 }
  0x3b   :  { %683 = vmatprep.subr.bf16.mxu1 %v1116_v54  ;;  %v1399_v54 = vsub.s32 1, %v1385_v45 }
  0x3c   :  { %1031 = vmatpush3.bf16.msra.mxu0 %v1130_v63 }
  0x3e   :  { %684 = vmatpush1.bf16.msra.mxu1 %v1119_v57 }
  0x3f   :  { %685 = vmatprep.subr.bf16.mxu1 %v1121_v58 }
  0x42   :  { %686 = vmatpush1.bf16.msra.mxu1 %v1124_v61 }
  0x43   :  { %687 = vmatprep.subr.bf16.mxu1 %v1126_v62 }
  0x46   :  { %688 = vmatpush1.bf16.msra.mxu1 %v1129_v0  ;;  %v961_v0 = vld [vmem:[%s1473_s3 + $0x1] ss:$8 sm:$0x3] }
  0xdd   :  { %v138_v1 = vpop.f32.mrb[0].mxu0 }
  0xde   :  { %v229_v2 = vrot.slane %v138_v1, 4  ;;  %v241_v3 = vmul.f32 %v138_v1, %v138_v1  ;;  %v140_v4 = vpop.f32.mrb[1].mxu0 }
  0xdf   :  { %v235_v5 = vrot.slane %v140_v4, 4  ;;  %v242_v6 = vmul.f32 %v140_v4, %v140_v4  ;;  %v142_v7 = vpop.f32.mrb[2].mxu0 }
  0xe0   :  { %v230_v8 = vadd.f32 %v229_v2, %v138_v1  ;;  %v243_v9 = vrot.slane %v241_v3, 4  ;;  %v143_v10 = vpop.f32.mrb[3].mxu0 }
  0xe1   :  { %v236_v11 = vadd.f32 %v235_v5, %v140_v4  ;;  %v249_v12 = vrot.slane %v242_v6, 4 }
  0xe2   :  { %v231_v13 = vrot.slane %v230_v8, 2  ;;  %v244_v14 = vadd.f32 %v243_v9, %v241_v3 }
  0xe3   :  { %v237_v15 = vrot.slane %v236_v11, 2  ;;  %v250_v16 = vadd.f32 %v249_v12, %v242_v6 }
  0xe4   :  { %v232_v17 = vadd.f32 %v231_v13, %v230_v8  ;;  %v245_v18 = vrot.slane %v244_v14, 2 }
  0xe5   :  { %v238_v19 = vadd.f32 %v237_v15, %v236_v11  ;;  %v251_v20 = vrot.slane %v250_v16, 2 }
  0xe6   :  { %v233_v21 = vrot.slane %v232_v17, 1  ;;  %v246_v22 = vadd.f32 %v245_v18, %v244_v14 }
  0xe7   :  { %v239_v23 = vrot.slane %v238_v19, 1  ;;  %v252_v24 = vadd.f32 %v251_v20, %v250_v16 }
  0xe8   :  { %v234_v25 = vadd.f32 %v233_v21, %v232_v17  ;;  %v247_v26 = vrot.slane %v246_v22, 1 }
  0xe9   :  { %v240_v27 = vadd.f32 %v239_v23, %v238_v19  ;;  %v253_v28 = vrot.slane %v252_v24, 1 }
  0xea   :  { %v248_v29 = vadd.f32 %v247_v26, %v246_v22  ;;  %v255_v30 = vmul.f32 0.125, %v234_v25  ;;  %v179_v11 = vpop.f32.mrb[4].mxu0 }
  0xeb   :  { %v254_v31 = vadd.f32 %v253_v28, %v252_v24  ;;  %v256_v32 = vmul.f32 0.125, %v240_v27  ;;  %v181_v12 = vpop.f32.mrb[5].mxu0 }
  0xec   :  { %v257_v33 = vmul.f32 0.125, %v248_v29  ;;  %v259_v34 = vmul.f32 %v255_v30, %v255_v30  ;;  %v183_v13 = vpop.f32.mrb[6].mxu0 }
  0xed   :  { %v258_v35 = vmul.f32 0.125, %v254_v31  ;;  %v260_v36 = vmul.f32 %v256_v32, %v256_v32  ;;  %v184_v14 = vpop.f32.mrb[7].mxu0 }
  0xee   :  { %v261_v37 = vsub.f32 %v257_v33, %v259_v34 }
  0xef   :  { %v262_v38 = vsub.f32 %v258_v35, %v260_v36 }
  0xf0   :  { %v263_v39 = vadd.f32 1e-05, %v261_v37 }
  0xf1   :  { %v264_v40 = vadd.f32 1e-05, %v262_v38 }
  0xf2   :  { %1131 = vrsqrt.f32 %v263_v39  ;;  %v220_v15 = vpop.f32.mrb[8].mxu0 }
  0xf3   :  { %1133 = vrsqrt.f32 %v264_v40  ;;  %v1044_v16 = vpop.f32.mrb[9].mxu0 }
  0xf4   :  { %v223_v17 = vpop.f32.mrb[10].mxu0 }
  0xf5   :  { %v1045_v18 = vpop.f32.mrb[11].mxu0 }
  0xfc   :  { %v1132_v46 = vpop.eup %1131 }
  0xfd   :  { %v1134_v48 = vpop.eup %1133 }
  0xfe   :  { %v269_v49 = vcombine.low %v1132_v46, %v1134_v48 }
 0x100   :  { %v276_v50 = vrot.slane %v269_v49, %v1388_v47 }
 0x102   :  { %v283_v52 = vrot.slane %v276_v50, %v1388_v47 }
 0x104   :  { %v285_v55 = vmul.f32 %v283_v52, %v226_v51 }
 0x106   :  { %v290_v56 = vrot.slane %v285_v55, %v1396_v53  ;;  %v294_v57 = vrot.slane %v285_v55, %v1399_v54 }
 0x108   :  { %v297_v58 = vmul.f32 %v290_v56, %v255_v30  ;;  %v298_v59 = vmul.f32 %v294_v57, %v256_v32  ;;  %v319_v60 = vmul.f32 %v294_v57, %v140_v4  ;;  %v318_v61 = vmul.f32 %v290_v56, %v138_v1 }
 0x10a   :  { %v301_v62 = vcombine.low %v297_v58, %v298_v59 }
 0x10c   :  { %v308_v63 = vrot.slane %v301_v62, %v1388_v47 }
 0x10e   :  { %v315_v2 = vrot.slane %v308_v63, %v1388_v47 }
 0x110   :  { %v317_v3 = vsub.f32 %v961_v0, %v315_v2 }
 0x112   :  { %v328_v5 = vrot.slane %v317_v3, %v1399_v54  ;;  %v324_v6 = vrot.slane %v317_v3, %v1396_v53 }
 0x114   :  { %v332_v7 = vadd.f32 %v328_v5, %v319_v60  ;;  %v331_v8 = vadd.f32 %v324_v6, %v318_v61 }
 0x116   :  { %v334_v9 = vmax.f32 %v332_v7, 0.0  ;;  %v333_v10 = vmax.f32 %v331_v8, 0.0 }
 0x118   :  { %v336_v4 = vpack.c.bf16 %v334_v9, %v334_v9  ;;  %v335_v1 = vpack.c.bf16 %v333_v10, %v333_v10 }
 0x11a   :  { %689 = vmatprep.mubr.bf16.mxu1 %v336_v4  ;;  %730 = vmatprep.mubr.bf16.mxu0 %v336_v4 }
 0x11b   :  { %690 = vmatmul.mubr.bf16.vlgmr.msra.gmra.mrb[0].mxu1 %v335_v1  ;;  %731 = vmatmul.mubr.bf16.vlgmr.msra.gmra.mrb[12].mxu0 %v335_v1 }
 0x1ee   :  { %v691_v19 = vpop.f32.mrb[0].mxu1  ;;  %v1032_v20 = vpop.f32.mrb[12].mxu0 }
 0x1ef   :  { %v1410_v21 = vadd.f32 %v691_v19, %v179_v11  ;;  %v693_v22 = vpop.f32.mrb[1].mxu1  ;;  %v1033_v23 = vpop.f32.mrb[13].mxu0 }
 0x1f0   :  { %v1412_v24 = vadd.f32 %v693_v22, %v181_v12  ;;  %v1034_v25 = vadd.f32 %v1033_v23, %v1032_v20  ;;  %v695_v26 = vpop.f32.mrb[2].mxu1  ;;  %v1035_v27 = vpop.f32.mrb[14].mxu0 }
 0x1f1   :  { %v742_v28 = vrot.slane %v1410_v21, 4  ;;  %v762_v29 = vmul.f32 %v1410_v21, %v1410_v21  ;;  %v696_v30 = vpop.f32.mrb[3].mxu1  ;;  %v1036_v31 = vpop.f32.mrb[15].mxu0 }
 0x1f2   :  { %v748_v32 = vrot.slane %v1412_v24, 4  ;;  %v763_v33 = vmul.f32 %v1412_v24, %v1412_v24  ;;  %v1420_v34 = vadd.f32 %v1034_v25, %v220_v15 }
 0x1f3   :  { %v743_v35 = vadd.f32 %v742_v28, %v1410_v21  ;;  %v765_v36 = vrot.slane %v762_v29, 4 }
 0x1f4   :  { %v749_v37 = vadd.f32 %v748_v32, %v1412_v24  ;;  %v771_v38 = vrot.slane %v763_v33, 4  ;;  %v764_v39 = vmul.f32 %v1420_v34, %v1420_v34  ;;  %v755_v40 = vsel %vm754_vm3, %v1420_v34, 0.0 }
 0x1f5   :  { %v744_v41 = vrot.slane %v743_v35, 2  ;;  %v766_v42 = vadd.f32 %v765_v36, %v762_v29  ;;  %v756_v43 = vrot.slane %v755_v40, 4 }
 0x1f6   :  { %v750_v44 = vrot.slane %v749_v37, 2  ;;  %v772_v46 = vadd.f32 %v771_v38, %v763_v33  ;;  %v777_v48 = vsel %vm754_vm3, %v764_v39, 0.0  ;;  %v841_v39 = vsub.s32 2, %v1385_v45 }
 0x1f7   :  { %v745_v49 = vadd.f32 %v744_v41, %v743_v35  ;;  %v767_v50 = vrot.slane %v766_v42, 2  ;;  %v757_v51 = vadd.f32 %v756_v43, %v755_v40  ;;  %v778_v52 = vrot.slane %v777_v48, 4 }
 0x1f8   :  { %v751_v55 = vadd.f32 %v750_v44, %v749_v37  ;;  %v773_v56 = vrot.slane %v772_v46, 2  ;;  %v1010_v37 = vld [vmem:[%s1473_s3 + $0x2] ss:$8 sm:$0x7] }
 0x1f9   :  { %v746_v57 = vrot.slane %v745_v49, 1  ;;  %v768_v58 = vadd.f32 %v767_v50, %v766_v42  ;;  %v758_v59 = vrot.slane %v757_v51, 2  ;;  %v779_v60 = vadd.f32 %v778_v52, %v777_v48 }
 0x1fa   :  { %v752_v61 = vrot.slane %v751_v55, 1  ;;  %v774_v62 = vadd.f32 %v773_v56, %v772_v46 }
 0x1fb   :  { %v747_v63 = vadd.f32 %v746_v57, %v745_v49  ;;  %v769_v0 = vrot.slane %v768_v58, 1  ;;  %v759_v2 = vadd.f32 %v758_v59, %v757_v51  ;;  %v780_v3 = vrot.slane %v779_v60, 2  ;;  %v1011_v57 = vld [vmem:[%s1473_s3 + $0x3] ss:$8 sm:$0x7] }
 0x1fc   :  { %v753_v5 = vadd.f32 %v752_v61, %v751_v55  ;;  %v775_v6 = vrot.slane %v774_v62, 1 }
 0x1fd   :  { %v770_v7 = vadd.f32 %v769_v0, %v768_v58  ;;  %v784_v8 = vmul.f32 0.125, %v747_v63  ;;  %v760_v9 = vrot.slane %v759_v2, 1  ;;  %v781_v10 = vadd.f32 %v780_v3, %v779_v60 }
 0x1fe   :  { %v776_v4 = vadd.f32 %v775_v6, %v774_v62  ;;  %v785_v1 = vmul.f32 0.125, %v753_v5 }
 0x1ff   :  { %v787_v11 = vmul.f32 0.125, %v770_v7  ;;  %v790_v12 = vmul.f32 %v784_v8, %v784_v8  ;;  %v761_v13 = vadd.f32 %v760_v9, %v759_v2  ;;  %v782_v14 = vrot.slane %v781_v10, 1 }
 0x200   :  { %v788_v15 = vmul.f32 0.125, %v776_v4  ;;  %v791_v16 = vmul.f32 %v785_v1, %v785_v1 }
 0x201   :  { %v793_v17 = vsub.f32 %v787_v11, %v790_v12  ;;  %v783_v18 = vadd.f32 %v782_v14, %v781_v10  ;;  %v786_v19 = vmul.f32 0.125, %v761_v13 }
 0x202   :  { %v794_v20 = vsub.f32 %v788_v15, %v791_v16 }
 0x203   :  { %v796_v22 = vadd.f32 1e-05, %v793_v17  ;;  %v789_v23 = vmul.f32 0.125, %v783_v18  ;;  %v792_v25 = vmul.f32 %v786_v19, %v786_v19 }
 0x204   :  { %v797_v26 = vadd.f32 1e-05, %v794_v20 }
 0x205   :  { %1135 = vrsqrt.f32 %v796_v22  ;;  %v795_v27 = vsub.f32 %v789_v23, %v792_v25 }
 0x206   :  { %1137 = vrsqrt.f32 %v797_v26 }
 0x207   :  { %v798_v28 = vadd.f32 1e-05, %v795_v27 }
 0x209   :  { %1139 = vrsqrt.f32 %v798_v28 }
 0x20f   :  { %v1136_v29 = vpop.eup %1135 }
 0x210   :  { %v1138_v30 = vpop.eup %1137 }
 0x211   :  { %v805_v31 = vcombine.low %v1136_v29, %v1138_v30 }
 0x213   :  { %v1140_v32 = vpop.eup %1139  ;;  %v812_v33 = vrot.slane %v805_v31, %v1388_v47 }
 0x214   :  { %v819_v35 = vrot.slane %v1140_v32, %v1388_v47 }
 0x216   :  { %v820_v36 = vcombine.low %v812_v33, %v819_v35 }
 0x218   :  { %v827_v38 = vrot.slane %v820_v36, %v1388_v47 }
 0x21a   :  { %v829_v40 = vmul.f32 %v1010_v37, %v827_v38 }
 0x21c   :  { %v834_v41 = vrot.slane %v829_v40, %v1396_v53  ;;  %v838_v42 = vrot.slane %v829_v40, %v1399_v54  ;;  %v842_v43 = vrot.slane %v829_v40, %v841_v39 }
 0x21e   :  { %v846_v44 = vmul.f32 %v834_v41, %v784_v8  ;;  %v847_v46 = vmul.f32 %v838_v42, %v785_v1  ;;  %v848_v48 = vmul.f32 %v842_v43, %v786_v19  ;;  %v877_v49 = vmul.f32 %v834_v41, %v1410_v21  ;;  %v1012_v21 = vld [vmem:[%s1473_s3 + $0x4] ss:$8 sm:$0x7] }
 0x21f   :  { %v878_v50 = vmul.f32 %v838_v42, %v1412_v24  ;;  %v879_v51 = vmul.f32 %v842_v43, %v1420_v34  ;;  %v908_v61 = vrot.slane %v1012_v21, %v1396_v53  ;;  %v912_v62 = vrot.slane %v1012_v21, %v1399_v54 }
 0x220   :  { %v852_v52 = vcombine.low %v846_v44, %v847_v46  ;;  %v866_v45 = vrot.slane %v848_v48, %v1388_v47  ;;  %v916_v3 = vrot.slane %v1012_v21, %v841_v39 }
 0x222   :  { %v859_v55 = vrot.slane %v852_v52, %v1388_v47 }
 0x224   :  { %v867_v56 = vcombine.low %v859_v55, %v866_v45 }
 0x226   :  { %v874_v58 = vrot.slane %v867_v56, %v1388_v47 }
 0x228   :  { %v876_v59 = vsub.f32 %v1011_v57, %v874_v58 }
 0x22a   :  { %v884_v24 = vrot.slane %v876_v59, %v1396_v53  ;;  %v888_v34 = vrot.slane %v876_v59, %v1399_v54  ;;  %v892_v60 = vrot.slane %v876_v59, %v841_v39  ;;  %v929_v53 = vstv %s1474_s4 }
 0x22c   :  { %v896_v63 = vadd.f32 %v884_v24, %v877_v49  ;;  %v897_v0 = vadd.f32 %v888_v34, %v878_v50  ;;  %v898_v2 = vadd.f32 %v892_v60, %v879_v51 }
 0x22e   :  { %v899_v5 = vmax.f32 %v896_v63, 0.0  ;;  %v900_v47 = vmax.f32 %v897_v0, 0.0  ;;  %v901_v6 = vmax.f32 %v898_v2, 0.0 }
 0x230   :  { %v920_v7 = vmul.f32 %v908_v61, %v899_v5  ;;  %v921_v8 = vmul.f32 %v912_v62, %v900_v47  ;;  %v922_v9 = vmul.f32 %v916_v3, %v901_v6 }
 0x232   :  { %v923_v10 = vadd.f32 %v921_v8, %v920_v7  ;;  %v924_v4 = vsel %vm754_vm3, %v922_v9, 0.0 }
 0x234   :  { %v925_v1 = vadd.f32 %v924_v4, %v923_v10 }
 0x236   :  { %926 = vadd.xlane.f32.xlu0 %v925_v1 }
 0x2c3   :  { %v927_v54 = vpop.xlane.xlu0 %926 }
 0x2c4   :  { %v930_v11 = vadd.f32 %v929_v53, %v927_v54 }
 0x2c6   :  { %931 = vst [vmem:[#allocation3] sm:$0xff] %v930_v11 }
 0x2c7   :  { %1152 = shalt.err (!%p1149_p4)
}
 0x2c8   :  { %s1153_s18 = scalar_lea.hbm %s1475_s5, 128 }
 0x2c9   :  { %p1154_p5 = scmp.ne.s32.totalorder %s1475_s5, %s1153_s18  ;;  %p1157_p6 = scmp.lt.u32.totalorder %s1153_s18, %s1475_s5 }
 0x2cb   :  { %p1159_p7 = pnand %p1157_p6, %p1154_p5 }
 0x2cd   :  { %1162 = shalt.err (!%p1159_p7)
}
 0x2ce   :  { %941 = dma.vmem_to_hbm [thread:$0]  %s939_s14, 128, %s1475_s5, [#allocation4]  }
 0x2cf   :  { %1163 = dma.done.wait [#allocation4], 128  }
 0x2d0   :  { %1164 = vsyncadd [#allocation4], 4294967168 }
 0x2d1   :  { %945 = vsyncpa [#allocation4], 1 }

</bundles_post_ra>
